<compile_context>
chip_gen: v5e
topology: v5e:2x2
jax: 0.10.0
libtpu: 0.0.40
codegen_flags: <defaults>
</compile_context>

<pallas_src>
import functools

import jax
import jax.numpy as jnp
from jax.experimental import pallas as pl
from jax.experimental.pallas import tpu as pltpu


def _rmsnorm_kernel(x_ref, w_ref, o_ref, *, eps):
    x = x_ref[...].astype(jnp.float32)                 # (tile_rows, d_model)
    w = w_ref[...].astype(jnp.float32)                 # (1, d_model)
    ms = jnp.mean(x * x, axis=-1, keepdims=True)       # (tile_rows, 1)
    inv = jax.lax.rsqrt(ms + eps)                      # (tile_rows, 1) -> EUP
    o_ref[...] = (x * inv * w).astype(o_ref.dtype)


def _round_up(n, m):
    return ((n + m - 1) // m) * m


def _choose_tile_rows(rows, d_model, itemsize, row_align,
                      block_budget_bytes=32 * 1024 * 1024,
                      max_tile_rows=1024):
    """Largest row tile s.t. double-buffered in+out blocks fit the budget."""
    # 2 arrays (input + output) x 2 pipeline buffers each
    bytes_per_row = max(1, d_model * itemsize * 2 * 2)
    tile = block_budget_bytes // bytes_per_row
    tile = (tile // row_align) * row_align
    tile = max(row_align, min(tile, max_tile_rows))
    # no point tiling beyond what the problem needs
    needed = _round_up(rows, row_align)
    return min(tile, needed)


def rmsnorm(x, weight, eps=1e-5, *, tile_rows=None):
    """RMSNorm over the last axis of x.

    x:      (..., d_model)
    weight: (d_model,)
    """
    orig_shape = x.shape
    d_model = orig_shape[-1]
    rows = 1
    for s in orig_shape[:-1]:
        rows *= s

    x2d = x.reshape(rows, d_model)
    w2d = weight.reshape(1, d_model)

    # 16-bit dtypes pack two rows per sublane; keep tiles aligned accordingly.
    row_align = 16 if x.dtype.itemsize == 2 else 8

    if tile_rows is None:
        tile_rows = _choose_tile_rows(rows, d_model, x.dtype.itemsize, row_align)
    else:
        tile_rows = max(row_align, _round_up(int(tile_rows), row_align))

    # Ragged row counts: let Pallas handle the partial last block (masked
    # writeback). Each row normalizes independently, so garbage in the OOB
    # fringe never contaminates valid rows.
    grid = (pl.cdiv(rows, tile_rows),)

    out = pl.pallas_call(
        functools.partial(_rmsnorm_kernel, eps=eps),
        out_shape=jax.ShapeDtypeStruct((rows, d_model), x.dtype),
        grid=grid,
        in_specs=[
            pl.BlockSpec((tile_rows, d_model), lambda i: (i, 0)),
            # constant block index -> weight stays resident in VMEM
            pl.BlockSpec((1, d_model), lambda i: (0, 0)),
        ],
        out_specs=pl.BlockSpec((tile_rows, d_model), lambda i: (i, 0)),
        compiler_params=pltpu.CompilerParams(
            dimension_semantics=("parallel",),      # shards rows across TCs on v7x
            vmem_limit_bytes=48 * 1024 * 1024,      # fits v5e/v6e/v7x VMEM
        ),
    )(x2d, w2d)

    return out.reshape(orig_shape)


if __name__ == "__main__":
    key = jax.random.PRNGKey(0)
    # small shapes consistent with the module; d_model multiple of 128 for
    # lane-dense loads/stores.
    batch, seq, d_model = 2, 8, 128
    x = jax.random.normal(key, (batch, seq, d_model), dtype=jnp.float32)
    # deterministic parameter init: nn.Parameter(torch.ones(d_model))
    weight = jnp.ones((d_model,), dtype=jnp.float32)

    out = rmsnorm(x, weight, eps=1e-5)
    out = jax.block_until_ready(out)

    # reference check in plain JAX
    ref = x * jax.lax.rsqrt(jnp.mean(x * x, axis=-1, keepdims=True) + 1e-5) * weight
    assert jnp.allclose(out, ref, atol=1e-5, rtol=1e-5), "mismatch vs reference"

    # also exercise a ragged row count (rows not a multiple of the row tile)
    x2 = jax.random.normal(jax.random.PRNGKey(1), (3, 7, d_model), dtype=jnp.float32)
    out2 = jax.block_until_ready(rmsnorm(x2, weight, eps=1e-5))
    ref2 = x2 * jax.lax.rsqrt(jnp.mean(x2 * x2, axis=-1, keepdims=True) + 1e-5) * weight
    assert jnp.allclose(out2, ref2, atol=1e-5, rtol=1e-5), "mismatch vs reference (ragged)"

    # bf16 path (16-row sublane packing) with a tiny explicit tile to force a
    # multi-step grid with a partial last block.
    x3 = jax.random.normal(jax.random.PRNGKey(2), (5, 9, d_model), dtype=jnp.bfloat16)
    out3 = jax.block_until_ready(rmsnorm(x3, weight.astype(jnp.bfloat16),
                                         eps=1e-5, tile_rows=16))
    x3f = x3.astype(jnp.float32)
    ref3 = (x3f * jax.lax.rsqrt(jnp.mean(x3f * x3f, axis=-1, keepdims=True) + 1e-5)
            * weight).astype(jnp.bfloat16)
    assert jnp.allclose(out3.astype(jnp.float32), ref3.astype(jnp.float32),
                        atol=2e-2, rtol=2e-2), "mismatch vs reference (bf16)"

    print("KERNEL_OK")
</pallas_src>

<mosaic_0001>
module attributes {stable_mosaic.version = 11 : i64} {
  func.func @_rmsnorm_kernel(%arg0: i32, %arg1: memref<16x128xf32, #tpu.memory_space<vmem>>, %arg2: memref<1x128xf32, #tpu.memory_space<vmem>>, %arg3: memref<16x128xf32, #tpu.memory_space<vmem>>) attributes {dimension_semantics = [#tpu.dimension_semantics<parallel>], iteration_bounds = array<i64: 1>, scalar_prefetch = 0 : i64, scratch_operands = 0 : i64, tpu.core_type = #tpu.core_type<tc>, window_params = [{transform_indices = @transform_0, window_bounds = array<i64: 16, 128>}, {pipeline_mode = #tpu.pipeline_mode<synchronous>, transform_indices = @transform_1, window_bounds = array<i64: 1, 128>}, {transform_indices = @transform_2, window_bounds = array<i64: 16, 128>}]} {
    %c0 = arith.constant 0 : index
    %c0_0 = arith.constant 0 : index
    %0 = vector.load %arg1[%c0, %c0_0] : memref<16x128xf32, #tpu.memory_space<vmem>>, vector<16x128xf32>
    %c0_1 = arith.constant 0 : index
    %c0_2 = arith.constant 0 : index
    %1 = vector.load %arg2[%c0_1, %c0_2] : memref<1x128xf32, #tpu.memory_space<vmem>>, vector<1x128xf32>
    %2 = arith.mulf %0, %0 : vector<16x128xf32>
    %cst = arith.constant dense<0.000000e+00> : vector<16xf32>
    %3 = vector.multi_reduction <add>, %2, %cst [1] : vector<16x128xf32> to vector<16xf32>
    %4 = vector.shape_cast %3 : vector<16xf32> to vector<16x1xf32>
    %cst_3 = arith.constant 1.280000e+02 : f32
    %5 = vector.broadcast %cst_3 : f32 to vector<16x1xf32>
    %6 = arith.divf %4, %5 : vector<16x1xf32>
    %cst_4 = arith.constant 9.99999974E-6 : f32
    %7 = vector.broadcast %cst_4 : f32 to vector<16x1xf32>
    %8 = arith.addf %6, %7 : vector<16x1xf32>
    %9 = math.rsqrt %8 : vector<16x1xf32>
    %10 = vector.broadcast %9 : vector<16x1xf32> to vector<16x128xf32>
    %11 = arith.mulf %0, %10 : vector<16x128xf32>
    %12 = vector.broadcast %1 : vector<1x128xf32> to vector<16x128xf32>
    %13 = arith.mulf %11, %12 : vector<16x128xf32>
    %c0_5 = arith.constant 0 : index
    %c0_6 = arith.constant 0 : index
    %14 = vector.load %arg3[%c0_5, %c0_6] : memref<16x128xf32, #tpu.memory_space<vmem>>, vector<16x128xf32>
    tpu.vector_store %arg3[%c0_5, %c0_6], %13 {strides = array<i32>} : memref<16x128xf32, #tpu.memory_space<vmem>>, vector<16x128xf32>,
    return
  }
  func.func @transform_0(%arg0: i32) -> (i32, i32) {
    %c0_i32 = arith.constant 0 : i32
    %c0_i32_0 = arith.constant 0 : i32
    return %arg0, %c0_i32 : i32, i32
  }
  func.func @transform_1(%arg0: i32) -> (i32, i32) {
    %c0_i32 = arith.constant 0 : i32
    %c0_i32_0 = arith.constant 0 : i32
    %c0_i32_1 = arith.constant 0 : i32
    return %c0_i32, %c0_i32_0 : i32, i32
  }
  func.func @transform_2(%arg0: i32) -> (i32, i32) {
    %c0_i32 = arith.constant 0 : i32
    %c0_i32_0 = arith.constant 0 : i32
    return %arg0, %c0_i32 : i32, i32
  }
}

</mosaic_0001>

<bundles_post_ra>
// kernel: tpu_custom_call.1
= control target key start
LH: loop header
LB: loop body
LE: loop exit
PB: predicated region body
PF: predicated region fallthrough
CT: control target
= control target key end

     0   :  { %7 = vsyncpa [#allocation3], 0  ;;  %s238_s0 = inlined_call_operand.hbm [shape: f32[16,128], index: 0, kind: input, shape index: {}]   ;;  %s239_s1 = inlined_call_operand.hbm [shape: f32[1,128], index: 1, kind: input, shape index: {}]   ;;  %s240_s2 = inlined_call_operand.hbm [shape: f32[16,128], index: 2, kind: output, shape index: {}]  }
   0x1   :  { %8 = vsyncpa [#allocation6], 0 }
   0x2   :  { %9 = vsyncpa [#allocation4], 0  ;;  %s14_s11 = sshll.u32 %s238_s0, 4  ;;  %s202_s12 = smov [#allocation2]   ;;  %s15_s11 = int_to_ptr.hbm [resolvable:$true] %s14_s11 }
   0x3   :  { %s16_s13 = sshll.u32 %s202_s12, 4  ;;  %s28_s16 = sshll.u32 %s239_s1, 4  ;;  %s17_s13 = int_to_ptr.vmem [resolvable:$true] %s16_s13  ;;  %s29_s16 = int_to_ptr.hbm [resolvable:$true] %s28_s16 }
   0x4   :  { %s203_s17 = smov 128   ;;  %s204_s18 = smov 8  }
   0x5   :  { %22 = dma.hbm_to_vmem [thread:$0]  %s15_s11, 256, %s17_s13, [#allocation3], %s203_s17, %s203_s17, %s204_s18  }
   0x6   :  { %s205_s19 = smov [#allocation5]  }
   0x7   :  { %s30_s20 = sshll.u32 %s205_s19, 4  ;;  %s31_s20 = int_to_ptr.vmem [resolvable:$true] %s30_s20 }
   0x8   :  { %33 = dma.hbm_to_vmem [thread:$0]  %s29_s16, 16, %s31_s20, [#allocation6]  }
   0x9   :  { %196 = dma.done.wait [#allocation3], 256  }
   0xa   :  { %197 = vsyncadd [#allocation3], 4294967040 }
   0xb   :  { %198 = dma.done.wait [#allocation6], 16  }
   0xc   :  { %199 = vsyncadd [#allocation6], 4294967280  ;;  %v42_v0 = vld [vmem:[#allocation2] sm:$0xff]  ;;  %v43_v2 = vld [vmem:[#allocation2 + $0x8] sm:$0xff]  ;;  %v206_v4 = vmov 128.0   ;;  %s207_s0 = smov [#allocation7]  }
   0xd   :  { %v45_v1 = vmul.f32 %v42_v0, %v42_v0  ;;  %v46_v3 = vmul.f32 %v43_v2, %v43_v2  ;;  %118 = vrcp.f32 %v206_v4  ;;  %v117_v25 = vld [vmem:[#allocation5] ss:$0 sm:$0xff]  ;;  %s95_s1 = sshll.u32 %s207_s0, 4  ;;  %s97_s23 = sshll.u32 %s240_s2, 4  ;;  %s96_s1 = int_to_ptr.vmem [resolvable:$true] %s95_s1  ;;  %s98_s23 = int_to_ptr.hbm [resolvable:$true] %s97_s23 }
   0xf   :  { %47 = vadd.xlane.f32.xlu0 %v45_v1 }
  0x13   :  { %v119_v5 = vpop.eup %118 }
  0x14   :  { %v52_v6 = vmul.f32 128.0, %v119_v5  ;;  %vm56_vm0 = vweird.f32 %v119_v5 }
  0x16   :  { %v53_v7 = vsub.f32 1.0, %v52_v6 }
  0x17   :  { %49 = vadd.xlane.f32.xlu0 %v46_v3 }
  0x18   :  { %v54_v8 = vmul.f32 %v119_v5, %v53_v7 }
  0x1a   :  { %v55_v9 = vadd.f32 %v119_v5, %v54_v8 }
  0x1c   :  { %v57_v10 = vsel %vm56_vm0, %v119_v5, %v55_v9 }
  0x82   :  { %v48_v11 = vpop.xlane.xlu0 %47 }
  0x83   :  { %v58_v12 = vmul.f32 %v57_v10, %v48_v11 }
  0x85   :  { %v60_v13 = vadd.f32 1e-05, %v58_v12 }
  0x87   :  { %120 = vrsqrt.f32 %v60_v13  ;;  %vm68_vm2 = vweird.f32 %v60_v13 }
  0x8a   :  { %v50_v14 = vpop.xlane.xlu0 %49 }
  0x8b   :  { %v59_v15 = vmul.f32 %v57_v10, %v50_v14 }
  0x8d   :  { %v121_v16 = vpop.eup %120  ;;  %v61_v17 = vadd.f32 1e-05, %v59_v15 }
  0x8e   :  { %v63_v18 = vmul.f32 %v121_v16, %v60_v13  ;;  %vm69_vm1 = vweird.f32 %v121_v16 }
  0x8f   :  { %122 = vrsqrt.f32 %v61_v17  ;;  %vm70_vm3 = vmor %vm68_vm2, %vm69_vm1  ;;  %vm78_vm5 = vweird.f32 %v61_v17 }
  0x90   :  { %v64_v19 = vmul.f32 %v121_v16, %v63_v18 }
  0x92   :  { %v65_v20 = vmul.f32 0.5, %v64_v19 }
  0x94   :  { %v66_v21 = vsub.f32 1.5, %v65_v20 }
  0x95   :  { %v123_v22 = vpop.eup %122 }
  0x96   :  { %v67_v23 = vmul.f32 %v121_v16, %v66_v21  ;;  %v73_v24 = vmul.f32 %v123_v22, %v61_v17  ;;  %vm79_vm4 = vweird.f32 %v123_v22 }
  0x97   :  { %vm80_vm6 = vmor %vm78_vm5, %vm79_vm4 }
  0x98   :  { %v71_v26 = vsel %vm70_vm3, %v121_v16, %v67_v23  ;;  %v74_v27 = vmul.f32 %v123_v22, %v73_v24 }
  0x99   :  { %v82_v28 = vmul.f32 %v71_v26, %v42_v0 }
  0x9a   :  { %v75_v29 = vmul.f32 0.5, %v74_v27 }
  0x9b   :  { %v87_v30 = vmul.f32 %v117_v25, %v82_v28 }
  0x9c   :  { %v76_v31 = vsub.f32 1.5, %v75_v29 }
  0x9d   :  { %89 = vst [vmem:[#allocation7] sm:$0xff] %v87_v30 }
  0x9e   :  { %v77_v32 = vmul.f32 %v123_v22, %v76_v31 }
  0xa0   :  { %v81_v33 = vsel %vm80_vm6, %v123_v22, %v77_v32 }
  0xa1   :  { %v83_v34 = vmul.f32 %v81_v33, %v43_v2 }
  0xa3   :  { %v88_v35 = vmul.f32 %v117_v25, %v83_v34 }
  0xa5   :  { %90 = vst [vmem:[#allocation7 + $0x8] sm:$0xff] %v88_v35 }
  0xa6   :  { %103 = dma.vmem_to_hbm [thread:$0]  %s96_s1, 256, %s98_s23, [#allocation4], %s203_s17, %s203_s17, %s204_s18  }
  0xa7   :  { %200 = dma.done.wait [#allocation4], 256  }
  0xa8   :  { %201 = vsyncadd [#allocation4], 4294967040 }
  0xa9   :  { %108 = vsyncpa [#allocation3], 1 }
  0xaa   :  { %109 = vsyncpa [#allocation6], 1 }
  0xab   :  { %110 = vsyncpa [#allocation4], 1 }

</bundles_post_ra>
